<compile_context>
chip_gen: v7x
topology: tpu7x:2x2x1
jax: 0.10.0
libtpu: 0.0.40
codegen_flags: <defaults>
</compile_context>

<pallas_src>
import functools

import jax
import jax.numpy as jnp
from jax.experimental import pallas as pl
from jax.experimental.pallas import tpu as pltpu

_SUBLANE = 8
_VMEM_LIMIT_BYTES = 32 * 1024 * 1024   # explicit scoped-VMEM limit (safe on v5e/v6e/v7x)
_VMEM_BUDGET_BYTES = 20 * 1024 * 1024  # what tile sizing may consume (headroom vs the limit)
_TARGET_STEP_BYTES = 2 * 1024 * 1024   # ~2 MiB streamed HBM bytes per grid step


def _mlp_kernel(x_ref, w1_ref, b1_ref, w2_ref, b2_ref, o_ref):
    # x streams in its stored dtype; cast to bf16 in-kernel (VPU convert is free
    # while HBM-bound) so both dots run at the MXU's native bf16 rate.
    x = x_ref[...].astype(w1_ref.dtype)
    h = jnp.dot(x, w1_ref[...], preferred_element_type=jnp.float32)
    h = h + b1_ref[...]                    # f32 bias broadcast over batch rows
    h = jnp.maximum(h, 0.2 * h)            # LeakyReLU(0.2) == max(x, 0.2x) for slope in (0,1)
    y = jnp.dot(h.astype(w2_ref.dtype), w2_ref[...],
                preferred_element_type=jnp.float32)
    y = y + b2_ref[...]
    # output_dim < 128 -> 16-lane masked vst; accepted (see header note).
    o_ref[...] = y.astype(o_ref.dtype)


def _round_up(n, m):
    return ((n + m - 1) // m) * m


def _pick_block_b(batch, input_dim, hidden_dim, output_dim,
                  x_itemsize, out_itemsize):
    """Batch-row tile: as large as the VMEM budget / per-step byte target allow."""
    # Resident weights + biases; conservatively charged as double-buffered.
    weight_bytes = 2 * (input_dim * hidden_dim * 2        # W1 bf16
                        + hidden_dim * output_dim * 2     # W2 bf16
                        + hidden_dim * 4 + output_dim * 4)  # biases f32
    avail = max(_VMEM_BUDGET_BYTES - weight_bytes, 1 << 20)
    # Per-batch-row VMEM: 2x double-buffered x tile, 2x double-buffered out
    # tile, plus the f32 hidden intermediate and its bf16 copy (vreg/spill est).
    per_row = (2 * input_dim * x_itemsize
               + 2 * output_dim * out_itemsize
               + hidden_dim * (4 + 2))
    vmem_rows = max(_SUBLANE, (avail // per_row) // _SUBLANE * _SUBLANE)

    # Per-step streamed HBM bytes (x in, out back).  Small total -> one step
    # (v5e/v6e have one TC; a forced split only adds ~0.35us/step).  Large
    # total -> even step count so v7x's two TCs get balanced work.
    stream_row = input_dim * x_itemsize + output_dim * out_itemsize
    total_bytes = batch * stream_row
    if total_bytes <= 2 * _TARGET_STEP_BYTES:
        steps = 1
    else:
        steps = pl.cdiv(total_bytes, _TARGET_STEP_BYTES)
        steps += steps % 2
    rows = _round_up(pl.cdiv(batch, steps), _SUBLANE)

    return max(_SUBLANE, min(rows, vmem_rows, _round_up(batch, _SUBLANE)))


@functools.partial(jax.jit, static_argnames=("block_b", "out_dtype"))
def normalization_block(x, w1, b1, w2, b2, *, block_b=None, out_dtype=None):
    """Pallas NormalizationBlock.forward: LeakyReLU(x@W1+b1, 0.2) @ W2 + b2.

    x : (B, input_dim), any float dtype (streamed as-is; cast to bf16 in-kernel)
    w1: (input_dim, hidden_dim)    b1: (hidden_dim,) or (1, hidden_dim)
    w2: (hidden_dim, output_dim)   b2: (output_dim,) or (1, output_dim)
    Output dtype defaults to x.dtype (matches the f32 PyTorch module);
    pass out_dtype=jnp.bfloat16 to opt into a bf16 output.
    """
    B, input_dim = x.shape
    hidden_dim = w1.shape[1]
    output_dim = w2.shape[1]
    if out_dtype is None:
        out_dtype = x.dtype

    # Weights in bf16 for the MXU; convert once at init (see __main__) -- this
    # branch only fires if a caller passes f32 weights.
    w1 = w1 if w1.dtype == jnp.bfloat16 else w1.astype(jnp.bfloat16)
    w2 = w2 if w2.dtype == jnp.bfloat16 else w2.astype(jnp.bfloat16)
    # Biases: accept (dim,) or (1, dim); added to the f32 accumulator.
    b1 = b1.reshape(1, hidden_dim).astype(jnp.float32)
    b2 = b2.reshape(1, output_dim).astype(jnp.float32)

    if block_b is None:
        block_b = _pick_block_b(B, input_dim, hidden_dim, output_dim,
                                x.dtype.itemsize, jnp.dtype(out_dtype).itemsize)

    grid = (pl.cdiv(B, block_b),)  # partial last tile handled by block padding;
                                   # padded rows are never copied back past B.

    cost = pl.CostEstimate(
        flops=2 * B * (input_dim * hidden_dim + hidden_dim * output_dim),
        transcendentals=0,
        bytes_accessed=(x.size * x.dtype.itemsize
                        + w1.size * 2 + w2.size * 2 + b1.size * 4 + b2.size * 4
                        + B * output_dim * jnp.dtype(out_dtype).itemsize),
    )

    return pl.pallas_call(
        _mlp_kernel,
        out_shape=jax.ShapeDtypeStruct((B, output_dim), out_dtype),
        grid_spec=pltpu.PrefetchScalarGridSpec(
            num_scalar_prefetch=0,
            grid=grid,
            in_specs=[
                # x tile (last dim = full input_dim; 32-lane masked loads are
                # accepted -- the load slots have slack while HBM-bound).
                pl.BlockSpec((block_b, input_dim), lambda i: (i, 0)),
                # Grid-invariant index_maps keep W1/b1/W2/b2 resident in VMEM.
                pl.BlockSpec((input_dim, hidden_dim), lambda i: (0, 0)),
                pl.BlockSpec((1, hidden_dim), lambda i: (0, 0)),
                pl.BlockSpec((hidden_dim, output_dim), lambda i: (0, 0)),
                pl.BlockSpec((1, output_dim), lambda i: (0, 0)),
            ],
            out_specs=pl.BlockSpec((block_b, output_dim), lambda i: (i, 0)),
        ),
        compiler_params=pltpu.CompilerParams(
            dimension_semantics=("parallel",),
            vmem_limit_bytes=_VMEM_LIMIT_BYTES,
        ),
        cost_estimate=cost,
    )(x, w1, b1, w2, b2)


def init_params(key, input_dim, output_dim, hidden_dim=128):
    """nn.Linear-style init; weights stored (in, out) since y = x @ W.T + b."""
    k1, k2, k3, k4 = jax.random.split(key, 4)
    s1 = 1.0 / jnp.sqrt(input_dim)
    s2 = 1.0 / jnp.sqrt(hidden_dim)
    w1 = jax.random.uniform(k1, (input_dim, hidden_dim), jnp.float32, -s1, s1)
    b1 = jax.random.uniform(k2, (hidden_dim,), jnp.float32, -s1, s1)
    w2 = jax.random.uniform(k3, (hidden_dim, output_dim), jnp.float32, -s2, s2)
    b2 = jax.random.uniform(k4, (output_dim,), jnp.float32, -s2, s2)
    return w1, b1, w2, b2


if __name__ == "__main__":
    key = jax.random.PRNGKey(0)
    kx, kp = jax.random.split(key)

    batch, input_dim, hidden_dim, output_dim = 64, 32, 128, 16
    x = jax.random.normal(kx, (batch, input_dim), jnp.float32)
    w1, b1, w2, b2 = init_params(kp, input_dim, output_dim, hidden_dim)

    # One-time weight conversion to the MXU compute dtype ("convert at init",
    # outside the per-call hot path).
    w1_c = w1.astype(jnp.bfloat16)
    w2_c = w2.astype(jnp.bfloat16)

    out = normalization_block(x, w1_c, b1, w2_c, b2)   # auto block_b=64, grid=(1,)
    out = jax.block_until_ready(out)

    # f32 reference using the same bf16-rounded weights, so the only numeric
    # deltas are the in-kernel bf16 cast of x and the MXU bf16 products.
    h_ref = x @ w1_c.astype(jnp.float32) + b1[None, :]
    h_ref = jnp.maximum(h_ref, 0.2 * h_ref)
    ref = h_ref @ w2_c.astype(jnp.float32) + b2[None, :]

    assert out.shape == (batch, output_dim)
    assert out.dtype == x.dtype                      # f32 output by default
    assert jnp.allclose(out.astype(jnp.float32), ref, atol=3e-2, rtol=3e-2)

    print("KERNEL_OK")
</pallas_src>

<mosaic_0001>
module attributes {stable_mosaic.version = 11 : i64} {
  func.func @_mlp_kernel(%arg0: i32, %arg1: memref<64x32xf32, #tpu.memory_space<vmem>>, %arg2: memref<32x128xbf16, #tpu.memory_space<vmem>>, %arg3: memref<1x128xf32, #tpu.memory_space<vmem>>, %arg4: memref<128x16xbf16, #tpu.memory_space<vmem>>, %arg5: memref<1x16xf32, #tpu.memory_space<vmem>>, %arg6: memref<64x16xf32, #tpu.memory_space<vmem>>) attributes {dimension_semantics = [#tpu.dimension_semantics<parallel>], iteration_bounds = array<i64: 1>, scalar_prefetch = 0 : i64, scratch_operands = 0 : i64, tpu.core_type = #tpu.core_type<tc>, window_params = [{transform_indices = @transform_0, window_bounds = array<i64: 64, 32>}, {pipeline_mode = #tpu.pipeline_mode<synchronous>, transform_indices = @transform_1, window_bounds = array<i64: 32, 128>}, {pipeline_mode = #tpu.pipeline_mode<synchronous>, transform_indices = @transform_2, window_bounds = array<i64: 1, 128>}, {pipeline_mode = #tpu.pipeline_mode<synchronous>, transform_indices = @transform_3, window_bounds = array<i64: 128, 16>}, {pipeline_mode = #tpu.pipeline_mode<synchronous>, transform_indices = @transform_4, window_bounds = array<i64: 1, 16>}, {transform_indices = @transform_5, window_bounds = array<i64: 64, 16>}]} {
    %c0 = arith.constant 0 : index
    %c0_0 = arith.constant 0 : index
    %0 = vector.load %arg1[%c0, %c0_0] : memref<64x32xf32, #tpu.memory_space<vmem>>, vector<64x32xf32>
    %1 = arith.truncf %0 : vector<64x32xf32> to vector<64x32xbf16>
    %c0_1 = arith.constant 0 : index
    %c0_2 = arith.constant 0 : index
    %2 = vector.load %arg2[%c0_1, %c0_2] : memref<32x128xbf16, #tpu.memory_space<vmem>>, vector<32x128xbf16>
    %cst = arith.constant dense<0.000000e+00> : vector<64x128xf32>
    %3 = tpu.matmul %1, %2, %cst {dimension_numbers = #tpu.dot_dimension_numbers<[1], [0], [0], [1], [0, 0, 1, 1], [], []>} : vector<64x32xbf16>, vector<32x128xbf16>, vector<64x128xf32> -> vector<64x128xf32>
    %c0_3 = arith.constant 0 : index
    %c0_4 = arith.constant 0 : index
    %4 = vector.load %arg3[%c0_3, %c0_4] : memref<1x128xf32, #tpu.memory_space<vmem>>, vector<1x128xf32>
    %5 = vector.broadcast %4 : vector<1x128xf32> to vector<64x128xf32>
    %6 = arith.addf %3, %5 : vector<64x128xf32>
    %cst_5 = arith.constant 2.000000e-01 : f32
    %7 = vector.broadcast %cst_5 : f32 to vector<64x128xf32>
    %8 = arith.mulf %7, %6 : vector<64x128xf32>
    %9 = arith.maximumf %6, %8 : vector<64x128xf32>
    %10 = arith.truncf %9 : vector<64x128xf32> to vector<64x128xbf16>
    %c0_6 = arith.constant 0 : index
    %c0_7 = arith.constant 0 : index
    %11 = vector.load %arg4[%c0_6, %c0_7] : memref<128x16xbf16, #tpu.memory_space<vmem>>, vector<128x16xbf16>
    %cst_8 = arith.constant dense<0.000000e+00> : vector<64x16xf32>
    %12 = tpu.matmul %10, %11, %cst_8 {dimension_numbers = #tpu.dot_dimension_numbers<[1], [0], [0], [1], [0, 0, 1, 1], [], []>} : vector<64x128xbf16>, vector<128x16xbf16>, vector<64x16xf32> -> vector<64x16xf32>
    %c0_9 = arith.constant 0 : index
    %c0_10 = arith.constant 0 : index
    %13 = vector.load %arg5[%c0_9, %c0_10] : memref<1x16xf32, #tpu.memory_space<vmem>>, vector<1x16xf32>
    %14 = vector.broadcast %13 : vector<1x16xf32> to vector<64x16xf32>
    %15 = arith.addf %12, %14 : vector<64x16xf32>
    %c0_11 = arith.constant 0 : index
    %c0_12 = arith.constant 0 : index
    %16 = vector.load %arg6[%c0_11, %c0_12] : memref<64x16xf32, #tpu.memory_space<vmem>>, vector<64x16xf32>
    tpu.vector_store %arg6[%c0_11, %c0_12], %15 {strides = array<i32>} : memref<64x16xf32, #tpu.memory_space<vmem>>, vector<64x16xf32>,
    return
  }
  func.func @transform_0(%arg0: i32) -> (i32, i32) {
    %c0_i32 = arith.constant 0 : i32
    %c0_i32_0 = arith.constant 0 : i32
    return %arg0, %c0_i32 : i32, i32
  }
  func.func @transform_1(%arg0: i32) -> (i32, i32) {
    %c0_i32 = arith.constant 0 : i32
    %c0_i32_0 = arith.constant 0 : i32
    %c0_i32_1 = arith.constant 0 : i32
    return %c0_i32, %c0_i32_0 : i32, i32
  }
  func.func @transform_2(%arg0: i32) -> (i32, i32) {
    %c0_i32 = arith.constant 0 : i32
    %c0_i32_0 = arith.constant 0 : i32
    %c0_i32_1 = arith.constant 0 : i32
    return %c0_i32, %c0_i32_0 : i32, i32
  }
  func.func @transform_3(%arg0: i32) -> (i32, i32) {
    %c0_i32 = arith.constant 0 : i32
    %c0_i32_0 = arith.constant 0 : i32
    %c0_i32_1 = arith.constant 0 : i32
    return %c0_i32, %c0_i32_0 : i32, i32
  }
  func.func @transform_4(%arg0: i32) -> (i32, i32) {
    %c0_i32 = arith.constant 0 : i32
    %c0_i32_0 = arith.constant 0 : i32
    %c0_i32_1 = arith.constant 0 : i32
    return %c0_i32, %c0_i32_0 : i32, i32
  }
  func.func @transform_5(%arg0: i32) -> (i32, i32) {
    %c0_i32 = arith.constant 0 : i32
    %c0_i32_0 = arith.constant 0 : i32
    return %arg0, %c0_i32 : i32, i32
  }
}

</mosaic_0001>

<bundles_post_ra>
// kernel: normalization_block.1
= control target key start
LH: loop header
LB: loop body
LE: loop exit
PB: predicated region body
PF: predicated region fallthrough
CT: control target
= control target key end

     0   :  { %vm56_vm0 = vcmask 261120   ;;  %vm290_vm1 = vcmask 130048   ;;  %s509_s1 = inlined_call_operand.vmem [shape: bf16[32,128], index: 1, kind: input, shape index: {}]   ;;  %s510_s0 = inlined_call_operand.vmem [shape: f32[64,32], index: 0, kind: input, shape index: {}]   ;;  %s511_s3 = inlined_call_operand.vmem [shape: bf16[128,16], index: 3, kind: input, shape index: {}]   ;;  %s512_s2 = inlined_call_operand.vmem [shape: f32[1,128], index: 2, kind: input, shape index: {}]   ;;  %s513_s4 = inlined_call_operand.vmem [shape: f32[1,16], index: 4, kind: input, shape index: {}]   ;;  %s514_s5 = inlined_call_operand.vmem [shape: f32[64,16], index: 5, kind: output, shape index: {}]  }
   0x1   :  { %v373_v0 = vld [vmem:[%s509_s1] sm:$0xff]   ;;  %v374_v1 = vld [vmem:[%s509_s1 + $0x8] sm:$0xff]   ;;  %v23_v5 = vld [vmem:[%s510_s0 + $0x10] sm:$0xff] }
   0x2   :  { %337 = vmatprep.subr.bf16.mxu0 %v373_v0  ;;  %v21_v2 = vld [vmem:[%s510_s0] sm:$0xff]  ;;  %v22_v3 = vld [vmem:[%s510_s0 + $0x8] sm:$0xff]  ;;  %v24_v6 = vld [vmem:[%s510_s0 + $0x18] sm:$0xff] }
   0x3   :  { %338 = vmatpush3.bf16.msra.mxu0 %v373_v0  ;;  %v29_v4 = vpack.c.bf16 %v22_v3, %v21_v2  ;;  %v25_v7 = vld [vmem:[%s510_s0 + $0x20] sm:$0xff]  ;;  %v26_v8 = vld [vmem:[%s510_s0 + $0x28] sm:$0xff]  ;;  %v30_v10 = vpack.c.bf16 %v24_v6, %v23_v5  ;;  %v27_v13 = vld [vmem:[%s510_s0 + $0x30] sm:$0xff] }
   0x4   :  { %339 = vmatprep.subr.bf16.mxu0 %v374_v1  ;;  %v375_v9 = vld [vmem:[%s511_s3] sm:$0xff]   ;;  %v376_v11 = vld [vmem:[%s511_s3 + $0x8] sm:$0xff]   ;;  %v31_v12 = vpack.c.bf16 %v26_v8, %v25_v7  ;;  %v377_v14 = vld [vmem:[%s511_s3 + $0x10] sm:$0xff]  }
   0x5   :  { %341 = vmatprep.mubr.msk.bf16.mxu0 %vm56_vm0, %v29_v4  ;;  %349 = vmatprep.subr.bf16.mxu1 %v375_v9  ;;  %v28_v15 = vld [vmem:[%s510_s0 + $0x38] sm:$0xff]  ;;  %v379_v18 = vld [vmem:[%s511_s3 + $0x20] sm:$0xff]   ;;  %v380_v19 = vld [vmem:[%s511_s3 + $0x28] sm:$0xff]  }
   0x6   :  { %350 = vmatpush3.bf16.msra.mxu1 %v375_v9  ;;  %v378_v16 = vld [vmem:[%s511_s3 + $0x18] sm:$0xff]   ;;  %v32_v17 = vpack.c.bf16 %v28_v15, %v27_v13  ;;  %v381_v20 = vld [vmem:[%s511_s3 + $0x30] sm:$0xff]   ;;  %v303_v22 = vld [vmem:[%s512_s2] ss:$0 sm:$0xff] }
   0x7   :  { %340 = vmatpush3.bf16.msra.mxu0 %v374_v1  ;;  %351 = vmatprep.subr.bf16.mxu1 %v376_v11  ;;  %v382_v21 = vld [vmem:[%s511_s3 + $0x38] sm:$0xff]   ;;  %v310_v59 = vld [vmem:[%s513_s4] ss:$0 sm:$0xff] }
   0xa   :  { %342 = vmatmul.mubr.msk.bf16.vlgmr.msra.gmra.mrb[0].mxu0 %vm56_vm0, %v30_v10  ;;  %352 = vmatpush3.bf16.msra.mxu1 %v376_v11 }
   0xb   :  { %345 = vmatprep.mubr.msk.bf16.mxu0 %vm56_vm0, %v31_v12  ;;  %353 = vmatprep.subr.bf16.mxu1 %v377_v14 }
   0xe   :  { %354 = vmatpush3.bf16.msra.mxu1 %v377_v14 }
   0xf   :  { %355 = vmatprep.subr.bf16.mxu1 %v378_v16 }
  0x12   :  { %346 = vmatmul.mubr.msk.bf16.gmra.mrb[4].mxu0 %vm56_vm0, %v32_v17  ;;  %356 = vmatpush3.bf16.msra.mxu1 %v378_v16 }
  0x13   :  { %357 = vmatprep.subr.bf16.mxu1 %v379_v18 }
  0x16   :  { %358 = vmatpush3.bf16.msra.mxu1 %v379_v18 }
  0x17   :  { %359 = vmatprep.subr.bf16.mxu1 %v380_v19 }
  0x1a   :  { %360 = vmatpush3.bf16.msra.mxu1 %v380_v19 }
  0x1b   :  { %361 = vmatprep.subr.bf16.mxu1 %v381_v20 }
  0x1e   :  { %362 = vmatpush3.bf16.msra.mxu1 %v381_v20 }
  0x1f   :  { %363 = vmatprep.subr.bf16.mxu1 %v382_v21 }
  0x22   :  { %364 = vmatpush3.bf16.msra.mxu1 %v382_v21 }
  0xdd   :  { %v343_v23 = vpop.f32.mrb[0].mxu0 }
  0xde   :  { %v112_v24 = vadd.f32 %v343_v23, %v303_v22  ;;  %v103_v25 = vpop.f32.mrb[1].mxu0 }
  0xdf   :  { %v104_v26 = vadd.f32 %v303_v22, %v103_v25  ;;  %v344_v27 = vpop.f32.mrb[2].mxu0 }
  0xe0   :  { %v136_v28 = vmul.f32 0.2, %v112_v24  ;;  %v115_v29 = vadd.f32 %v344_v27, %v303_v22  ;;  %v106_v30 = vpop.f32.mrb[3].mxu0 }
  0xe1   :  { %v134_v31 = vmul.f32 0.2, %v104_v26  ;;  %v107_v32 = vadd.f32 %v303_v22, %v106_v30 }
  0xe2   :  { %v137_v33 = vmul.f32 0.2, %v115_v29  ;;  %v144_v35 = vmax.f32 %v112_v24, %v136_v28 }
  0xe3   :  { %v135_v34 = vmul.f32 0.2, %v107_v32  ;;  %v142_v38 = vmax.f32 %v104_v26, %v134_v31 }
  0xe4   :  { %v145_v36 = vmax.f32 %v115_v29, %v137_v33 }
  0xe5   :  { %v347_v37 = vpop.f32.mrb[4].mxu0  ;;  %v143_v39 = vmax.f32 %v107_v32, %v135_v34 }
  0xe6   :  { %v128_v40 = vadd.f32 %v347_v37, %v303_v22  ;;  %v119_v41 = vpop.f32.mrb[5].mxu0  ;;  %v151_v42 = vpack.c.bf16 %v145_v36, %v144_v35 }
  0xe7   :  { %v120_v43 = vadd.f32 %v303_v22, %v119_v41  ;;  %v348_v44 = vpop.f32.mrb[6].mxu0  ;;  %v150_v45 = vpack.c.bf16 %v143_v39, %v142_v38 }
  0xe8   :  { %v140_v46 = vmul.f32 0.2, %v128_v40  ;;  %v131_v47 = vadd.f32 %v348_v44, %v303_v22  ;;  %v122_v48 = vpop.f32.mrb[7].mxu0 }
  0xe9   :  { %v138_v49 = vmul.f32 0.2, %v120_v43  ;;  %v123_v50 = vadd.f32 %v303_v22, %v122_v48  ;;  %365 = vmatprep.mubr.bf16.mxu1 %v150_v45 }
  0xea   :  { %v141_v51 = vmul.f32 0.2, %v131_v47  ;;  %366 = vmatmul.mubr.bf16.vlgmr.msra.gmra.mrb[0].mxu1 %v151_v42  ;;  %v148_v53 = vmax.f32 %v128_v40, %v140_v46 }
  0xeb   :  { %v139_v52 = vmul.f32 0.2, %v123_v50  ;;  %v146_v55 = vmax.f32 %v120_v43, %v138_v49 }
  0xec   :  { %v149_v54 = vmax.f32 %v131_v47, %v141_v51 }
  0xed   :  { %v147_v56 = vmax.f32 %v123_v50, %v139_v52 }
  0xee   :  { %v153_v57 = vpack.c.bf16 %v149_v54, %v148_v53 }
  0xef   :  { %v152_v58 = vpack.c.bf16 %v147_v56, %v146_v55 }
  0xf1   :  { %369 = vmatprep.mubr.bf16.mxu1 %v152_v58 }
  0xf2   :  { %370 = vmatmul.mubr.bf16.gmra.mrb[4].mxu1 %v153_v57 }
 0x1bd   :  { %v367_v60 = vpop.f32.mrb[0].mxu1 }
 0x1be   :  { %v268_v61 = vadd.f32 %v367_v60, %v310_v59  ;;  %v259_v62 = vpop.f32.mrb[1].mxu1 }
 0x1bf   :  { %v260_v63 = vadd.f32 %v310_v59, %v259_v62  ;;  %v368_v0 = vpop.f32.mrb[2].mxu1 }
 0x1c0   :  { %293 = vst.msk [vmem:[%s514_s5 + $0x10] sm:$0xff] %vm290_vm1, %v268_v61  ;;  %v271_v1 = vadd.f32 %v368_v0, %v310_v59  ;;  %v262_v2 = vpop.f32.mrb[3].mxu1 }
 0x1c1   :  { %291 = vst.msk [vmem:[%s514_s5] sm:$0xff] %vm290_vm1, %v260_v63  ;;  %v263_v3 = vadd.f32 %v310_v59, %v262_v2 }
 0x1c2   :  { %294 = vst.msk [vmem:[%s514_s5 + $0x18] sm:$0xff] %vm290_vm1, %v271_v1 }
 0x1c3   :  { %292 = vst.msk [vmem:[%s514_s5 + $0x8] sm:$0xff] %vm290_vm1, %v263_v3 }
 0x1c5   :  { %v371_v4 = vpop.f32.mrb[4].mxu1 }
 0x1c6   :  { %v284_v5 = vadd.f32 %v371_v4, %v310_v59  ;;  %v275_v6 = vpop.f32.mrb[5].mxu1 }
 0x1c7   :  { %v276_v7 = vadd.f32 %v310_v59, %v275_v6  ;;  %v372_v8 = vpop.f32.mrb[6].mxu1 }
 0x1c8   :  { %297 = vst.msk [vmem:[%s514_s5 + $0x30] sm:$0xff] %vm290_vm1, %v284_v5  ;;  %v287_v9 = vadd.f32 %v372_v8, %v310_v59  ;;  %v278_v10 = vpop.f32.mrb[7].mxu1 }
 0x1c9   :  { %295 = vst.msk [vmem:[%s514_s5 + $0x20] sm:$0xff] %vm290_vm1, %v276_v7  ;;  %v279_v11 = vadd.f32 %v310_v59, %v278_v10 }
 0x1ca   :  { %298 = vst.msk [vmem:[%s514_s5 + $0x38] sm:$0xff] %vm290_vm1, %v287_v9 }
 0x1cb   :  { %296 = vst.msk [vmem:[%s514_s5 + $0x28] sm:$0xff] %vm290_vm1, %v279_v11 }

</bundles_post_ra>
